<compile_context>
chip_gen: v7x
topology: tpu7x:2x2x1
jax: 0.10.0
libtpu: 0.0.40
codegen_flags: <defaults>
</compile_context>

<pallas_src>
import functools

import jax
import jax.numpy as jnp
from jax.experimental import pallas as pl
from jax.experimental.pallas import tpu as pltpu


def _rmsnorm_kernel(x_ref, o_ref, *, eps):
    # x_ref: (tile_rows, hidden) block in VMEM; reduce over the lane axis.
    x = x_ref[...].astype(jnp.float32)
    var = jnp.mean(x * x, axis=-1, keepdims=True)
    inv = jax.lax.rsqrt(var + eps)
    o_ref[...] = (x * inv).astype(o_ref.dtype)


def _pick_tile_rows(rows, hidden, itemsize):
    """Pick a row-tile: ~4 MiB input block, multiple of 16, >= ~8 grid steps."""
    target_block_bytes = 4 << 20
    per_row = max(hidden * itemsize, 1)
    tr = min(int(target_block_bytes // per_row), 1024)
    tr = max((tr // 16) * 16, 16)
    if tr >= rows:
        # Single block covering all rows (block dim == full array dim is legal
        # even if not a multiple of 8/16).
        return rows
    # Keep at least ~8 grid steps so the parallel axis can shard across
    # TensorCores (v7x megacore) without collapsing to 1-2 steps.
    cap = (rows // 8) // 16 * 16
    if cap >= 16:
        tr = min(tr, cap)
    return tr


def new_qwen2_moe_rmsnorm(hidden_states, weight=None, eps=1e-6, tile_rows=None):
    """weight is accepted for API parity with the PyTorch module but unused."""
    orig_shape = hidden_states.shape
    orig_dtype = hidden_states.dtype
    hidden = orig_shape[-1]
    rows = 1
    for d in orig_shape[:-1]:
        rows *= d
    x2d = hidden_states.reshape(rows, hidden)

    itemsize = jnp.dtype(orig_dtype).itemsize
    if tile_rows is None:
        tile_rows = _pick_tile_rows(rows, hidden, itemsize)
    tile_rows = min(tile_rows, rows)

    # Ragged last block is fine: rows are independent, the hidden (reduction)
    # axis is always complete, and out-of-bounds rows are masked on store.
    grid = (pl.cdiv(rows, tile_rows),)

    # VMEM budget: double-buffered in + out blocks (input dtype) plus the f32
    # upcast working set; cap at 48 MiB (headroom under v7x's 64 MiB physical).
    block_in_bytes = tile_rows * hidden * itemsize
    block_f32_bytes = tile_rows * hidden * 4
    vmem_needed = 4 * block_in_bytes + 2 * block_f32_bytes + (2 << 20)
    vmem_limit = int(min(max(vmem_needed, 16 << 20), 48 << 20))

    # TODO(synk): for very wide hidden (>=16K) a 2-D grid with a chunked
    # sum-of-squares pass would bound the f32 working set further.
    out = pl.pallas_call(
        functools.partial(_rmsnorm_kernel, eps=eps),
        out_shape=jax.ShapeDtypeStruct((rows, hidden), orig_dtype),
        grid_spec=pltpu.PrefetchScalarGridSpec(
            num_scalar_prefetch=0,
            grid=grid,
            in_specs=[pl.BlockSpec((tile_rows, hidden), lambda i: (i, 0))],
            out_specs=pl.BlockSpec((tile_rows, hidden), lambda i: (i, 0)),
        ),
        compiler_params=pltpu.CompilerParams(
            dimension_semantics=("parallel",),
            vmem_limit_bytes=vmem_limit,
        ),
    )(x2d)

    return out.reshape(orig_shape)


if __name__ == "__main__":
    key = jax.random.PRNGKey(0)
    batch, seq, hidden = 2, 8, 32
    x = jax.random.normal(key, (batch, seq, hidden), dtype=jnp.bfloat16)

    # Parameter for parity with the module (__init__: zeros(1)), unused in
    # forward just like the PyTorch version.
    weight = jnp.zeros((1,), dtype=jnp.float32)

    y = new_qwen2_moe_rmsnorm(x, weight=weight, eps=1e-6)
    jax.block_until_ready(y)

    # Reference check in plain JAX (same math).
    x32 = x.astype(jnp.float32)
    var = jnp.mean(x32 * x32, axis=-1, keepdims=True)
    ref = (x32 * jax.lax.rsqrt(var + 1e-6)).astype(x.dtype)
    assert y.shape == x.shape and y.dtype == x.dtype
    assert jnp.allclose(y.astype(jnp.float32), ref.astype(jnp.float32),
                        atol=1e-2, rtol=1e-2)

    print("KERNEL_OK")
</pallas_src>

<mosaic_0001>
module attributes {stable_mosaic.version = 11 : i64} {
  func.func @_rmsnorm_kernel(%arg0: i32, %arg1: memref<16x32xbf16, #tpu.memory_space<vmem>>, %arg2: memref<16x32xbf16, #tpu.memory_space<vmem>>) attributes {dimension_semantics = [#tpu.dimension_semantics<parallel>], iteration_bounds = array<i64: 1>, scalar_prefetch = 0 : i64, scratch_operands = 0 : i64, tpu.core_type = #tpu.core_type<tc>, window_params = [{transform_indices = @transform_0, window_bounds = array<i64: 16, 32>}, {transform_indices = @transform_1, window_bounds = array<i64: 16, 32>}]} {
    %c0 = arith.constant 0 : index
    %c0_0 = arith.constant 0 : index
    %0 = vector.load %arg1[%c0, %c0_0] : memref<16x32xbf16, #tpu.memory_space<vmem>>, vector<16x32xbf16>
    %1 = arith.extf %0 : vector<16x32xbf16> to vector<16x32xf32>
    %2 = arith.mulf %1, %1 : vector<16x32xf32>
    %cst = arith.constant dense<0.000000e+00> : vector<16xf32>
    %3 = vector.multi_reduction <add>, %2, %cst [1] : vector<16x32xf32> to vector<16xf32>
    %4 = vector.shape_cast %3 : vector<16xf32> to vector<16x1xf32>
    %cst_1 = arith.constant 3.200000e+01 : f32
    %5 = vector.broadcast %cst_1 : f32 to vector<16x1xf32>
    %6 = arith.divf %4, %5 : vector<16x1xf32>
    %cst_2 = arith.constant 9.99999997E-7 : f32
    %7 = vector.broadcast %cst_2 : f32 to vector<16x1xf32>
    %8 = arith.addf %6, %7 : vector<16x1xf32>
    %9 = math.rsqrt %8 : vector<16x1xf32>
    %10 = vector.broadcast %9 : vector<16x1xf32> to vector<16x32xf32>
    %11 = arith.mulf %1, %10 : vector<16x32xf32>
    %12 = arith.truncf %11 : vector<16x32xf32> to vector<16x32xbf16>
    %c0_3 = arith.constant 0 : index
    %c0_4 = arith.constant 0 : index
    %13 = vector.load %arg2[%c0_3, %c0_4] : memref<16x32xbf16, #tpu.memory_space<vmem>>, vector<16x32xbf16>
    tpu.vector_store %arg2[%c0_3, %c0_4], %12 {strides = array<i32>} : memref<16x32xbf16, #tpu.memory_space<vmem>>, vector<16x32xbf16>,
    return
  }
  func.func @transform_0(%arg0: i32) -> (i32, i32) {
    %c0_i32 = arith.constant 0 : i32
    %c0_i32_0 = arith.constant 0 : i32
    return %arg0, %c0_i32 : i32, i32
  }
  func.func @transform_1(%arg0: i32) -> (i32, i32) {
    %c0_i32 = arith.constant 0 : i32
    %c0_i32_0 = arith.constant 0 : i32
    return %arg0, %c0_i32 : i32, i32
  }
}

</mosaic_0001>

<bundles_post_ra>
// kernel: tpu_custom_call.1
= control target key start
LH: loop header
LB: loop body
LE: loop exit
PB: predicated region body
PF: predicated region fallthrough
CT: control target
= control target key end

     0   :  { %6 = vsyncpa [#allocation3], 0  ;;  %s181_s0 = inlined_call_operand.hbm [shape: bf16[16,32], index: 0, kind: input, shape index: {}]   ;;  %s182_s1 = inlined_call_operand.hbm [shape: bf16[16,32], index: 1, kind: output, shape index: {}]  }
   0x1   :  { %7 = vsyncpa [#allocation4], 0  ;;  %s137_s6 = smov [#allocation2]   ;;  %s89_s10 = scalar_lea.hbm %s181_s0, 128 }
   0x2   :  { %s13_s7 = sshll.u32 %s137_s6, 4  ;;  %p90_p0 = scmp.ne.s32.totalorder %s181_s0, %s89_s10  ;;  %s14_s7 = int_to_ptr.vmem [resolvable:$true] %s13_s7 }
   0x3   :  { %p93_p1 = scmp.lt.u32.totalorder %s89_s10, %s181_s0 }
   0x5   :  { %p95_p2 = pnand %p93_p1, %p90_p0 }
   0x7   :  { %98 = shalt.err (!%p95_p2)
}
   0x8   :  { %s99_s15 = scalar_lea.vmem %s14_s7, 128  ;;  %p104_p4 = scmp.lt.s32.totalorder %s14_s7, %s14_s7 }
   0x9   :  { %p100_p3 = scmp.ne.s32.totalorder %s14_s7, %s99_s15  ;;  %p105_p5 = scmp.lt.s32.totalorder %s99_s15, %s99_s15 }
   0xb   :  { %p106_p6 = por %p105_p5, %p104_p4 }
   0xd   :  { %p107_p7 = pnand %p106_p6, %p100_p3 }
   0xf   :  { %110 = shalt.err (!%p107_p7)
}
  0x10   :  { %s138_s16 = smov 64   ;;  %s139_s17 = smov 4  }
  0x11   :  { %19 = dma.hbm_to_vmem [thread:$0]  %s181_s0, 128, %s14_s7, [#allocation3], %s138_s16, %s138_s16, %s139_s17  }
  0x12   :  { %133 = dma.done.wait [#allocation3], 128  }
  0x13   :  { %134 = vsyncadd [#allocation3], 4294967168  ;;  %v78_v0 = vld [vmem:[#allocation2] sm:$0xff]   ;;  %vm29_vm0 = vcmask 261120   ;;  %vm53_vm1 = vcmask 257024   ;;  %s140_s0 = smov [#allocation5]  }
  0x14   :  { %v79_v1 = vunpack.c.l.bf16 %v78_v0  ;;  %v80_v2 = vunpack.c.h.bf16 %v78_v0  ;;  %s61_s20 = sshll.u32 %s140_s0, 4  ;;  %s62_s20 = int_to_ptr.vmem [resolvable:$true] %s61_s20 }
  0x15   :  { %s111_s21 = scalar_lea.vmem %s62_s20, 128  ;;  %p116_p9 = scmp.lt.s32.totalorder %s62_s20, %s62_s20 }
  0x16   :  { %v27_v3 = vmul.f32 %v79_v1, %v79_v1  ;;  %v28_v4 = vmul.f32 %v80_v2, %v80_v2  ;;  %p112_p8 = scmp.ne.s32.totalorder %s62_s20, %s111_s21  ;;  %p117_p10 = scmp.lt.s32.totalorder %s111_s21, %s111_s21 }
  0x18   :  { %v30_v5 = vsel %vm29_vm0, %v27_v3, 0.0  ;;  %v33_v6 = vsel %vm29_vm0, %v28_v4, 0.0  ;;  %p118_p11 = por %p117_p10, %p116_p9 }
  0x19   :  { %31 = vadd.xlane.f32.xlu0 %v30_v5 }
  0x1a   :  { %p119_p12 = pnand %p118_p11, %p112_p8 }
  0x1d   :  { %34 = vadd.xlane.f32.xlu0 %v33_v6 }
  0xa6   :  { %v32_v7 = vpop.xlane.xlu0 %31 }
  0xa7   :  { %v37_v8 = vmul.f32 0.03125, %v32_v7 }
  0xa9   :  { %v39_v9 = vadd.f32 1e-06, %v37_v8 }
  0xaa   :  { %v35_v10 = vpop.xlane.xlu0 %34 }
  0xab   :  { %85 = vrsqrt.f32 %v39_v9  ;;  %v38_v11 = vmul.f32 0.03125, %v35_v10 }
  0xad   :  { %v40_v12 = vadd.f32 1e-06, %v38_v11 }
  0xaf   :  { %87 = vrsqrt.f32 %v40_v12 }
  0xb5   :  { %v86_v13 = vpop.eup %85 }
  0xb6   :  { %v43_v14 = vmul.f32 %v86_v13, %v79_v1 }
  0xb8   :  { %v75_v15 = vpack.c.bf16 %v43_v14, %v43_v14 }
  0xb9   :  { %v88_v16 = vpop.eup %87 }
  0xba   :  { %v44_v17 = vmul.f32 %v88_v16, %v80_v2  ;;  %54 = vst.msk [vmem:[#allocation5] sm:$0xf] %vm53_vm1, %v75_v15 }
  0xbc   :  { %v76_v18 = vpack.c.bf16 %v44_v17, %v44_v17 }
  0xbe   :  { %55 = vst.msk [vmem:[#allocation5 + $0x4] sm:$0xf] %vm53_vm1, %v76_v18 }
  0xbf   :  { %122 = shalt.err (!%p119_p12)
}
  0xc0   :  { %s123_s24 = scalar_lea.hbm %s182_s1, 128 }
  0xc1   :  { %p124_p13 = scmp.ne.s32.totalorder %s182_s1, %s123_s24  ;;  %p127_p0 = scmp.lt.u32.totalorder %s123_s24, %s182_s1 }
  0xc3   :  { %p129_p1 = pnand %p127_p0, %p124_p13 }
  0xc5   :  { %132 = shalt.err (!%p129_p1)
}
  0xc6   :  { %67 = dma.vmem_to_hbm [thread:$0]  %s62_s20, 128, %s182_s1, [#allocation4], %s138_s16, %s138_s16, %s139_s17  }
  0xc7   :  { %135 = dma.done.wait [#allocation4], 128  }
  0xc8   :  { %136 = vsyncadd [#allocation4], 4294967168 }
  0xc9   :  { %71 = vsyncpa [#allocation3], 1 }
  0xca   :  { %72 = vsyncpa [#allocation4], 1 }

</bundles_post_ra>
